<compile_context>
chip_gen: v7x
topology: tpu7x:2x2x1
jax: 0.10.0
libtpu: 0.0.40
codegen_flags: <defaults>
</compile_context>

<pallas_src>
import functools

import jax
import jax.numpy as jnp
from jax.experimental import pallas as pl
from jax.experimental.pallas import tpu as pltpu


def _round_up(a, b):
    return (a + b - 1) // b * b


def _cdiv(a, b):
    return (a + b - 1) // b


def _tpu_kind():
    try:
        return jax.devices()[0].device_kind.lower()
    except Exception:
        return ""


def ensemble_kernel(num_models, resident, exp_dtype,
                    weighting_ref,   # SMEM scalar prefetch: (num_models,) f32
                    x_ref,           # VMEM: (TM, H) bf16
                    w_ref,           # VMEM: (H, Vp) bf16, or (num_models, H, Vp) if resident
                    b_ref,           # VMEM: (1, Vp) f32,  or (num_models, 1, Vp) if resident
                    out_ref):        # VMEM: (TM, Vp) f32 -- resident accumulator over models
    m = pl.program_id(1)

    if resident:
        w = w_ref[m]          # dynamic slab index into the VMEM-resident stack
        b = b_ref[m]          # (1, Vp)
    else:
        w = w_ref[...]
        b = b_ref[...]

    # logits = x @ W_m + b_m   (bf16 operands, f32 accumulate on the MXU)
    logits = jnp.dot(x_ref[...], w, preferred_element_type=jnp.float32) + b

    # softmax over vocab (lane) dim, weighted by this model's mixing coefficient
    row_max = jnp.max(logits, axis=-1, keepdims=True)
    shifted = logits - row_max
    if exp_dtype == jnp.float32:
        exps = jnp.exp(shifted)
    else:
        # v6e/v7x: bf16-capable EUP (~2x packed throughput); accuracy is already
        # bounded by the bf16 matmul.  Not used on v5e and older.
        exps = jnp.exp(shifted.astype(exp_dtype)).astype(jnp.float32)
    denom = jnp.sum(exps, axis=-1, keepdims=True)
    # Fold the model weight into the per-row scale; approx reciprocal lowers to
    # the EUP slot and co-issues with the VPU work.
    scale = weighting_ref[m] * pl.reciprocal(denom, approx=True)
    weighted = exps * scale

    if num_models == 1:
        out_ref[...] = jnp.log(weighted)
    else:
        last = num_models - 1

        @pl.when(m == 0)
        def _():
            out_ref[...] = weighted

        @pl.when(jnp.logical_and(m > 0, m < last))
        def _():
            out_ref[...] += weighted

        # Fused final accumulate + log: one less (TM, Vp) f32 pass per M tile.
        @pl.when(m == last)
        def _():
            out_ref[...] = jnp.log(out_ref[...] + weighted)


def ensemble_forward(x, weights, biases, model_weighting):
    """x: (batch, seq, hidden) f32
       weights: (num_models, hidden, vocab) f32
       biases:  (num_models, vocab) f32
       model_weighting: (num_models,) f32 (normalized inside)
       returns logprobs: (batch, seq, vocab) f32
    """
    batch, seq, hidden = x.shape
    num_models, _, vocab = weights.shape
    M = batch * seq

    w_norm = (model_weighting / jnp.sum(model_weighting)).astype(jnp.float32)

    # --- pad vocab to a multiple of 128 lanes -------------------------------
    # Padded vocab columns get a huge negative bias -> exp underflows to 0 ->
    # softmax unaffected; those columns are sliced off before returning.
    Vp = _round_up(vocab, 128)
    if Vp != vocab:
        weights = jnp.pad(weights, ((0, 0), (0, 0), (0, Vp - vocab)))
        biases = jnp.pad(biases, ((0, 0), (0, Vp - vocab)),
                         constant_values=-1e30)

    x_bf = x.reshape(M, hidden).astype(jnp.bfloat16)
    w_bf = weights.astype(jnp.bfloat16)
    b_f32 = biases.astype(jnp.float32).reshape(num_models, 1, Vp)

    # --- generation-aware knobs ---------------------------------------------
    kind = _tpu_kind()
    is_old = any(s in kind for s in ("v2", "v3", "v4", "v5"))  # no bf16 EUP/VPU
    is_v6 = "v6" in kind
    is_v7 = ("v7" in kind) or ("tpu7" in kind)
    big_vmem = (is_old or is_v6) and not is_v7                 # 128 MiB parts
    exp_dtype = jnp.float32 if is_old else jnp.bfloat16
    vmem_cap = (64 << 20) if big_vmem else (40 << 20)          # v7x: 64 MiB VMEM
    resident_budget = (48 << 20) if big_vmem else (20 << 20)

    w_stack_bytes = num_models * hidden * Vp * 2               # bf16 weight stack
    b_stack_bytes = num_models * Vp * 4
    want_resident = (w_stack_bytes + b_stack_bytes) <= resident_budget

    SG = 16  # sublane granularity for bf16 x tiles

    def run(resident, single_buffer):
        # M tile: when the weight stack is resident a moderate tile is enough;
        # otherwise use a larger tile to amortize the per-tile weight re-fetch.
        tm_target = 256 if resident else 512
        ntiles = _cdiv(M, tm_target)
        # Megacore: make sure the "parallel" M axis has >= 2 tiles when M allows
        # (v7x has 2 TensorCores; harmless elsewhere).
        if M >= 2 * SG:
            ntiles = max(ntiles, 2)
        ntiles = max(ntiles, 1)
        TM = _round_up(_cdiv(M, ntiles), SG)
        Mp = _round_up(M, TM)
        x_in = x_bf if Mp == M else jnp.pad(x_bf, ((0, Mp - M), (0, 0)))

        grid = (Mp // TM, num_models)

        if resident:
            # Whole stack resident: constant block index -> fetched exactly once.
            spec_kwargs = dict(pipeline_mode=pl.Buffered(1)) if single_buffer else {}
            w_spec = pl.BlockSpec((num_models, hidden, Vp),
                                  lambda i, m, w: (0, 0, 0), **spec_kwargs)
            b_spec = pl.BlockSpec((num_models, 1, Vp),
                                  lambda i, m, w: (0, 0, 0), **spec_kwargs)
            nbuf = 1 if single_buffer else 2
            w_bytes = nbuf * w_stack_bytes
            b_bytes = nbuf * b_stack_bytes
        else:
            # Streaming: per-model slab fetched each grid step (double-buffered).
            w_spec = pl.BlockSpec((None, hidden, Vp), lambda i, m, w: (m, 0, 0))
            b_spec = pl.BlockSpec((None, 1, Vp), lambda i, m, w: (m, 0, 0))
            w_bytes = 2 * hidden * Vp * 2
            b_bytes = 2 * 1 * Vp * 4

        # VMEM footprint: double-buffered bf16 x tile, weights/bias, the
        # double-buffered resident f32 output tile, plus f32 elementwise
        # temporaries (logits / exps / weighted).
        est = (2 * TM * hidden * 2 + w_bytes + b_bytes
               + 2 * TM * Vp * 4 + 3 * TM * Vp * 4)
        vmem_limit = int(max(min(2 * est + (4 << 20), vmem_cap),
                             est + (4 << 20)))

        kernel = functools.partial(ensemble_kernel, num_models, resident,
                                   exp_dtype)

        return pl.pallas_call(
            kernel,
            out_shape=jax.ShapeDtypeStruct((Mp, Vp), jnp.float32),
            grid_spec=pltpu.PrefetchScalarGridSpec(
                num_scalar_prefetch=1,                       # model_weighting -> SMEM
                grid=grid,
                in_specs=[
                    pl.BlockSpec((TM, hidden), lambda i, m, w: (i, 0)),  # x tile
                    w_spec,
                    b_spec,
                ],
                out_specs=pl.BlockSpec((TM, Vp), lambda i, m, w: (i, 0)),  # resident over m
            ),
            compiler_params=pltpu.CompilerParams(
                dimension_semantics=("parallel", "arbitrary"),
                vmem_limit_bytes=vmem_limit,
            ),
        )(w_norm, x_in, w_bf, b_f32)

    # Most -> least aggressive configuration; fall back if the compiler rejects
    # one on this chip generation.
    configs = []
    if want_resident:
        configs.append(dict(resident=True, single_buffer=True))
        configs.append(dict(resident=True, single_buffer=False))
    configs.append(dict(resident=False, single_buffer=False))

    out = None
    for idx, cfg in enumerate(configs):
        try:
            out = run(**cfg)
            break
        except Exception:
            if idx == len(configs) - 1:
                raise

    return out[:M, :vocab].reshape(batch, seq, vocab)


def reference_forward(x, weights, biases, model_weighting,
                      matmul_dtype=jnp.float32):
    w_norm = model_weighting / jnp.sum(model_weighting)
    logits = jnp.einsum("bsh,mhv->mbsv",
                        x.astype(matmul_dtype), weights.astype(matmul_dtype),
                        preferred_element_type=jnp.float32)
    logits = logits + biases[:, None, None, :]
    probs = jax.nn.softmax(logits, axis=-1)
    mixed = jnp.einsum("m,mbsv->bsv", w_norm, probs)
    return jnp.log(mixed)


def _check(batch, seq, hidden, vocab, num_models, seed):
    key = jax.random.PRNGKey(seed)
    kx, kw, kb, kwt = jax.random.split(key, 4)

    x = jax.random.normal(kx, (batch, seq, hidden), dtype=jnp.float32)
    weights = 0.1 * jax.random.normal(kw, (num_models, hidden, vocab),
                                      dtype=jnp.float32)
    biases = 0.05 * jax.random.normal(kb, (num_models, vocab),
                                      dtype=jnp.float32)
    model_weighting = jnp.abs(
        jax.random.normal(kwt, (num_models,), dtype=jnp.float32)) + 0.1

    out = ensemble_forward(x, weights, biases, model_weighting)
    out = jax.block_until_ready(out)
    assert out.shape == (batch, seq, vocab)

    # Same matmul precision class as the kernel (bf16) -> tight-ish tolerance
    # (the kernel additionally uses approx reciprocal and, on v6e/v7x, bf16 exp).
    ref_bf = reference_forward(x, weights, biases, model_weighting,
                               matmul_dtype=jnp.bfloat16)
    assert jnp.allclose(out, ref_bf, atol=1e-2, rtol=1e-2), "mismatch vs bf16 ref"

    # Full f32 reference -> semantics check with bf16-sized tolerance.
    ref_f32 = reference_forward(x, weights, biases, model_weighting,
                                matmul_dtype=jnp.float32)
    assert jnp.allclose(out, ref_f32, atol=5e-2, rtol=5e-2), "mismatch vs f32 ref"


if __name__ == "__main__":
    # Small shapes implied by the module: 3 linear "models" hidden -> vocab.
    _check(batch=2, seq=8, hidden=32, vocab=128, num_models=3, seed=0)
    # Exercise multiple M tiles and vocab padding (160 -> 256), plus the
    # single-model fused-log path.
    _check(batch=2, seq=200, hidden=32, vocab=160, num_models=3, seed=0)
    _check(batch=2, seq=40, hidden=32, vocab=128, num_models=1, seed=1)
    print("KERNEL_OK")
</pallas_src>

<mosaic_0001>
module attributes {stable_mosaic.version = 11 : i64} {
  func.func @ensemble_kernel(%arg0: i32, %arg1: i32, %arg2: memref<3xf32, #tpu.memory_space<smem>>, %arg3: memref<16x32xbf16, #tpu.memory_space<vmem>>, %arg4: memref<3x32x128xbf16, #tpu.memory_space<vmem>>, %arg5: memref<3x1x128xf32, #tpu.memory_space<vmem>>, %arg6: memref<16x128xf32, #tpu.memory_space<vmem>>) attributes {dimension_semantics = [#tpu.dimension_semantics<parallel>, #tpu.dimension_semantics<arbitrary>], iteration_bounds = array<i64: 1, 3>, scalar_prefetch = 1 : i64, scratch_operands = 0 : i64, tpu.core_type = #tpu.core_type<tc>, window_params = [{transform_indices = @transform_0, window_bounds = array<i64: 16, 32>}, {pipeline_mode = #tpu.pipeline_mode<synchronous>, transform_indices = @transform_1, window_bounds = array<i64: 3, 32, 128>}, {pipeline_mode = #tpu.pipeline_mode<synchronous>, transform_indices = @transform_2, window_bounds = array<i64: 3, 1, 128>}, {transform_indices = @transform_3, window_bounds = array<i64: 16, 128>}]} {
    %0 = arith.index_cast %arg1 : i32 to index
    %c0 = arith.constant 0 : index
    %c0_0 = arith.constant 0 : index
    %1 = vector.load %arg4[%0, %c0, %c0_0] : memref<3x32x128xbf16, #tpu.memory_space<vmem>>, vector<1x32x128xbf16>
    %2 = vector.shape_cast %1 : vector<1x32x128xbf16> to vector<32x128xbf16>
    %3 = arith.index_cast %arg1 : i32 to index
    %c0_1 = arith.constant 0 : index
    %c0_2 = arith.constant 0 : index
    %4 = vector.load %arg5[%3, %c0_1, %c0_2] : memref<3x1x128xf32, #tpu.memory_space<vmem>>, vector<1x1x128xf32>
    %5 = vector.shape_cast %4 : vector<1x1x128xf32> to vector<1x128xf32>
    %c0_3 = arith.constant 0 : index
    %c0_4 = arith.constant 0 : index
    %6 = vector.load %arg3[%c0_3, %c0_4] : memref<16x32xbf16, #tpu.memory_space<vmem>>, vector<16x32xbf16>
    %cst = arith.constant dense<0.000000e+00> : vector<16x128xf32>
    %7 = tpu.matmul %6, %2, %cst {dimension_numbers = #tpu.dot_dimension_numbers<[1], [0], [0], [1], [0, 0, 1, 1], [], []>} : vector<16x32xbf16>, vector<32x128xbf16>, vector<16x128xf32> -> vector<16x128xf32>
    %8 = vector.broadcast %5 : vector<1x128xf32> to vector<16x128xf32>
    %9 = arith.addf %7, %8 : vector<16x128xf32>
    %cst_5 = arith.constant dense<0xFF800000> : vector<16xf32>
    %10 = vector.multi_reduction <maximumf>, %9, %cst_5 [1] : vector<16x128xf32> to vector<16xf32>
    %11 = vector.shape_cast %10 : vector<16xf32> to vector<16x1xf32>
    %12 = vector.broadcast %11 : vector<16x1xf32> to vector<16x128xf32>
    %13 = arith.subf %9, %12 : vector<16x128xf32>
    %14 = arith.truncf %13 : vector<16x128xf32> to vector<16x128xbf16>
    %15 = math.exp %14 : vector<16x128xbf16>
    %16 = arith.extf %15 : vector<16x128xbf16> to vector<16x128xf32>
    %cst_6 = arith.constant dense<0.000000e+00> : vector<16xf32>
    %17 = vector.multi_reduction <add>, %16, %cst_6 [1] : vector<16x128xf32> to vector<16xf32>
    %18 = vector.shape_cast %17 : vector<16xf32> to vector<16x1xf32>
    %19 = arith.index_cast %arg1 : i32 to index
    %20 = memref.load %arg2[%19] : memref<3xf32, #tpu.memory_space<smem>>
    %21 = tpu.reciprocal %18 {approx = true} : vector<16x1xf32> -> vector<16x1xf32>
    %22 = vector.broadcast %20 : f32 to vector<16x1xf32>
    %23 = arith.mulf %22, %21 : vector<16x1xf32>
    %24 = vector.broadcast %23 : vector<16x1xf32> to vector<16x128xf32>
    %25 = arith.mulf %16, %24 : vector<16x128xf32>
    %c0_i32 = arith.constant 0 : i32
    %26 = arith.cmpi eq, %arg1, %c0_i32 : i32
    %27 = arith.extui %26 : i1 to i32
    %c0_i32_7 = arith.constant 0 : i32
    %28 = arith.cmpi ne, %27, %c0_i32_7 : i32
    scf.if %28 {
      %c0_12 = arith.constant 0 : index
      %c0_13 = arith.constant 0 : index
      %37 = vector.load %arg6[%c0_12, %c0_13] : memref<16x128xf32, #tpu.memory_space<vmem>>, vector<16x128xf32>
      tpu.vector_store %arg6[%c0_12, %c0_13], %25 {strides = array<i32>} : memref<16x128xf32, #tpu.memory_space<vmem>>, vector<16x128xf32>,
    } else {
    }
    %c0_i32_8 = arith.constant 0 : i32
    %29 = arith.cmpi sgt, %arg1, %c0_i32_8 : i32
    %c2_i32 = arith.constant 2 : i32
    %30 = arith.cmpi slt, %arg1, %c2_i32 : i32
    %31 = arith.andi %29, %30 : i1
    %32 = arith.extui %31 : i1 to i32
    %c0_i32_9 = arith.constant 0 : i32
    %33 = arith.cmpi ne, %32, %c0_i32_9 : i32
    scf.if %33 {
      %c0_12 = arith.constant 0 : index
      %c0_13 = arith.constant 0 : index
      %37 = vector.load %arg6[%c0_12, %c0_13] : memref<16x128xf32, #tpu.memory_space<vmem>>, vector<16x128xf32>
      %38 = arith.addf %37, %25 : vector<16x128xf32>
      %c0_14 = arith.constant 0 : index
      %c0_15 = arith.constant 0 : index
      %39 = vector.load %arg6[%c0_14, %c0_15] : memref<16x128xf32, #tpu.memory_space<vmem>>, vector<16x128xf32>
      tpu.vector_store %arg6[%c0_14, %c0_15], %38 {strides = array<i32>} : memref<16x128xf32, #tpu.memory_space<vmem>>, vector<16x128xf32>,
    } else {
    }
    %c2_i32_10 = arith.constant 2 : i32
    %34 = arith.cmpi eq, %arg1, %c2_i32_10 : i32
    %35 = arith.extui %34 : i1 to i32
    %c0_i32_11 = arith.constant 0 : i32
    %36 = arith.cmpi ne, %35, %c0_i32_11 : i32
    scf.if %36 {
      %c0_12 = arith.constant 0 : index
      %c0_13 = arith.constant 0 : index
      %37 = vector.load %arg6[%c0_12, %c0_13] : memref<16x128xf32, #tpu.memory_space<vmem>>, vector<16x128xf32>
      %38 = arith.addf %37, %25 : vector<16x128xf32>
      %39 = math.log %38 : vector<16x128xf32>
      %c0_14 = arith.constant 0 : index
      %c0_15 = arith.constant 0 : index
      %40 = vector.load %arg6[%c0_14, %c0_15] : memref<16x128xf32, #tpu.memory_space<vmem>>, vector<16x128xf32>
      tpu.vector_store %arg6[%c0_14, %c0_15], %39 {strides = array<i32>} : memref<16x128xf32, #tpu.memory_space<vmem>>, vector<16x128xf32>,
    } else {
    }
    return
  }
  func.func @transform_0(%arg0: i32, %arg1: i32, %arg2: memref<3xf32, #tpu.memory_space<smem>>) -> (i32, i32) {
    %c0_i32 = arith.constant 0 : i32
    %c0_i32_0 = arith.constant 0 : i32
    return %arg0, %c0_i32 : i32, i32
  }
  func.func @transform_1(%arg0: i32, %arg1: i32, %arg2: memref<3xf32, #tpu.memory_space<smem>>) -> (i32, i32, i32) {
    %c0_i32 = arith.constant 0 : i32
    %c0_i32_0 = arith.constant 0 : i32
    %c0_i32_1 = arith.constant 0 : i32
    %c0_i32_2 = arith.constant 0 : i32
    return %c0_i32, %c0_i32_0, %c0_i32_1 : i32, i32, i32
  }
  func.func @transform_2(%arg0: i32, %arg1: i32, %arg2: memref<3xf32, #tpu.memory_space<smem>>) -> (i32, i32, i32) {
    %c0_i32 = arith.constant 0 : i32
    %c0_i32_0 = arith.constant 0 : i32
    %c0_i32_1 = arith.constant 0 : i32
    %c0_i32_2 = arith.constant 0 : i32
    return %c0_i32, %c0_i32_0, %c0_i32_1 : i32, i32, i32
  }
  func.func @transform_3(%arg0: i32, %arg1: i32, %arg2: memref<3xf32, #tpu.memory_space<smem>>) -> (i32, i32) {
    %c0_i32 = arith.constant 0 : i32
    %c0_i32_0 = arith.constant 0 : i32
    return %arg0, %c0_i32 : i32, i32
  }
}

module attributes {stable_mosaic.version = 11 : i64} {
  func.func @ensemble_kernel(%arg0: i32, %arg1: i32, %arg2: memref<3xf32, #tpu.memory_space<smem>>, %arg3: memref<16x32xbf16, #tpu.memory_space<vmem>>, %arg4: memref<3x32x128xbf16, #tpu.memory_space<vmem>>, %arg5: memref<3x1x128xf32, #tpu.memory_space<vmem>>, %arg6: memref<16x128xf32, #tpu.memory_space<vmem>>) attributes {dimension_semantics = [#tpu.dimension_semantics<parallel>, #tpu.dimension_semantics<arbitrary>], iteration_bounds = array<i64: 1, 3>, scalar_prefetch = 1 : i64, scratch_operands = 0 : i64, tpu.core_type = #tpu.core_type<tc>, window_params = [{transform_indices = @transform_0, window_bounds = array<i64: 16, 32>}, {pipeline_mode = #tpu.pipeline_mode<synchronous>, transform_indices = @transform_1, window_bounds = array<i64: 3, 32, 128>}, {pipeline_mode = #tpu.pipeline_mode<synchronous>, transform_indices = @transform_2, window_bounds = array<i64: 3, 1, 128>}, {transform_indices = @transform_3, window_bounds = array<i64: 16, 128>}]} {
    %0 = arith.index_cast %arg1 : i32 to index
    %c0 = arith.constant 0 : index
    %c0_0 = arith.constant 0 : index
    %1 = vector.load %arg4[%0, %c0, %c0_0] : memref<3x32x128xbf16, #tpu.memory_space<vmem>>, vector<1x32x128xbf16>
    %2 = vector.shape_cast %1 : vector<1x32x128xbf16> to vector<32x128xbf16>
    %3 = arith.index_cast %arg1 : i32 to index
    %c0_1 = arith.constant 0 : index
    %c0_2 = arith.constant 0 : index
    %4 = vector.load %arg5[%3, %c0_1, %c0_2] : memref<3x1x128xf32, #tpu.memory_space<vmem>>, vector<1x1x128xf32>
    %5 = vector.shape_cast %4 : vector<1x1x128xf32> to vector<1x128xf32>
    %c0_3 = arith.constant 0 : index
    %c0_4 = arith.constant 0 : index
    %6 = vector.load %arg3[%c0_3, %c0_4] : memref<16x32xbf16, #tpu.memory_space<vmem>>, vector<16x32xbf16>
    %cst = arith.constant dense<0.000000e+00> : vector<16x128xf32>
    %7 = tpu.matmul %6, %2, %cst {dimension_numbers = #tpu.dot_dimension_numbers<[1], [0], [0], [1], [0, 0, 1, 1], [], []>} : vector<16x32xbf16>, vector<32x128xbf16>, vector<16x128xf32> -> vector<16x128xf32>
    %8 = vector.broadcast %5 : vector<1x128xf32> to vector<16x128xf32>
    %9 = arith.addf %7, %8 : vector<16x128xf32>
    %cst_5 = arith.constant dense<0xFF800000> : vector<16xf32>
    %10 = vector.multi_reduction <maximumf>, %9, %cst_5 [1] : vector<16x128xf32> to vector<16xf32>
    %11 = vector.shape_cast %10 : vector<16xf32> to vector<16x1xf32>
    %12 = vector.broadcast %11 : vector<16x1xf32> to vector<16x128xf32>
    %13 = arith.subf %9, %12 : vector<16x128xf32>
    %14 = arith.truncf %13 : vector<16x128xf32> to vector<16x128xbf16>
    %15 = math.exp %14 : vector<16x128xbf16>
    %16 = arith.extf %15 : vector<16x128xbf16> to vector<16x128xf32>
    %cst_6 = arith.constant dense<0.000000e+00> : vector<16xf32>
    %17 = vector.multi_reduction <add>, %16, %cst_6 [1] : vector<16x128xf32> to vector<16xf32>
    %18 = vector.shape_cast %17 : vector<16xf32> to vector<16x1xf32>
    %19 = arith.index_cast %arg1 : i32 to index
    %20 = memref.load %arg2[%19] : memref<3xf32, #tpu.memory_space<smem>>
    %21 = tpu.reciprocal %18 {approx = true} : vector<16x1xf32> -> vector<16x1xf32>
    %22 = vector.broadcast %20 : f32 to vector<16x1xf32>
    %23 = arith.mulf %22, %21 : vector<16x1xf32>
    %24 = vector.broadcast %23 : vector<16x1xf32> to vector<16x128xf32>
    %25 = arith.mulf %16, %24 : vector<16x128xf32>
    %c0_i32 = arith.constant 0 : i32
    %26 = arith.cmpi eq, %arg1, %c0_i32 : i32
    %27 = arith.extui %26 : i1 to i32
    %c0_i32_7 = arith.constant 0 : i32
    %28 = arith.cmpi ne, %27, %c0_i32_7 : i32
    scf.if %28 {
      %c0_12 = arith.constant 0 : index
      %c0_13 = arith.constant 0 : index
      %37 = vector.load %arg6[%c0_12, %c0_13] : memref<16x128xf32, #tpu.memory_space<vmem>>, vector<16x128xf32>
      tpu.vector_store %arg6[%c0_12, %c0_13], %25 {strides = array<i32>} : memref<16x128xf32, #tpu.memory_space<vmem>>, vector<16x128xf32>,
    } else {
    }
    %c0_i32_8 = arith.constant 0 : i32
    %29 = arith.cmpi sgt, %arg1, %c0_i32_8 : i32
    %c2_i32 = arith.constant 2 : i32
    %30 = arith.cmpi slt, %arg1, %c2_i32 : i32
    %31 = arith.andi %29, %30 : i1
    %32 = arith.extui %31 : i1 to i32
    %c0_i32_9 = arith.constant 0 : i32
    %33 = arith.cmpi ne, %32, %c0_i32_9 : i32
    scf.if %33 {
      %c0_12 = arith.constant 0 : index
      %c0_13 = arith.constant 0 : index
      %37 = vector.load %arg6[%c0_12, %c0_13] : memref<16x128xf32, #tpu.memory_space<vmem>>, vector<16x128xf32>
      %38 = arith.addf %37, %25 : vector<16x128xf32>
      %c0_14 = arith.constant 0 : index
      %c0_15 = arith.constant 0 : index
      %39 = vector.load %arg6[%c0_14, %c0_15] : memref<16x128xf32, #tpu.memory_space<vmem>>, vector<16x128xf32>
      tpu.vector_store %arg6[%c0_14, %c0_15], %38 {strides = array<i32>} : memref<16x128xf32, #tpu.memory_space<vmem>>, vector<16x128xf32>,
    } else {
    }
    %c2_i32_10 = arith.constant 2 : i32
    %34 = arith.cmpi eq, %arg1, %c2_i32_10 : i32
    %35 = arith.extui %34 : i1 to i32
    %c0_i32_11 = arith.constant 0 : i32
    %36 = arith.cmpi ne, %35, %c0_i32_11 : i32
    scf.if %36 {
      %c0_12 = arith.constant 0 : index
      %c0_13 = arith.constant 0 : index
      %37 = vector.load %arg6[%c0_12, %c0_13] : memref<16x128xf32, #tpu.memory_space<vmem>>, vector<16x128xf32>
      %38 = arith.addf %37, %25 : vector<16x128xf32>
      %39 = math.log %38 : vector<16x128xf32>
      %c0_14 = arith.constant 0 : index
      %c0_15 = arith.constant 0 : index
      %40 = vector.load %arg6[%c0_14, %c0_15] : memref<16x128xf32, #tpu.memory_space<vmem>>, vector<16x128xf32>
      tpu.vector_store %arg6[%c0_14, %c0_15], %39 {strides = array<i32>} : memref<16x128xf32, #tpu.memory_space<vmem>>, vector<16x128xf32>,
    } else {
    }
    return
  }
  func.func @transform_0(%arg0: i32, %arg1: i32, %arg2: memref<3xf32, #tpu.memory_space<smem>>) -> (i32, i32) {
    %c0_i32 = arith.constant 0 : i32
    %c0_i32_0 = arith.constant 0 : i32
    return %arg0, %c0_i32 : i32, i32
  }
  func.func @transform_1(%arg0: i32, %arg1: i32, %arg2: memref<3xf32, #tpu.memory_space<smem>>) -> (i32, i32, i32) {
    %c0_i32 = arith.constant 0 : i32
    %c0_i32_0 = arith.constant 0 : i32
    %c0_i32_1 = arith.constant 0 : i32
    %c0_i32_2 = arith.constant 0 : i32
    return %c0_i32, %c0_i32_0, %c0_i32_1 : i32, i32, i32
  }
  func.func @transform_2(%arg0: i32, %arg1: i32, %arg2: memref<3xf32, #tpu.memory_space<smem>>) -> (i32, i32, i32) {
    %c0_i32 = arith.constant 0 : i32
    %c0_i32_0 = arith.constant 0 : i32
    %c0_i32_1 = arith.constant 0 : i32
    %c0_i32_2 = arith.constant 0 : i32
    return %c0_i32, %c0_i32_0, %c0_i32_1 : i32, i32, i32
  }
  func.func @transform_3(%arg0: i32, %arg1: i32, %arg2: memref<3xf32, #tpu.memory_space<smem>>) -> (i32, i32) {
    %c0_i32 = arith.constant 0 : i32
    %c0_i32_0 = arith.constant 0 : i32
    return %arg0, %c0_i32 : i32, i32
  }
}

module attributes {stable_mosaic.version = 11 : i64} {
  func.func @ensemble_kernel(%arg0: i32, %arg1: i32, %arg2: memref<3xf32, #tpu.memory_space<smem>>, %arg3: memref<16x32xbf16, #tpu.memory_space<vmem>>, %arg4: memref<1x32x128xbf16, #tpu.memory_space<vmem>>, %arg5: memref<1x1x128xf32, #tpu.memory_space<vmem>>, %arg6: memref<16x128xf32, #tpu.memory_space<vmem>>) attributes {dimension_semantics = [#tpu.dimension_semantics<parallel>, #tpu.dimension_semantics<arbitrary>], iteration_bounds = array<i64: 1, 3>, scalar_prefetch = 1 : i64, scratch_operands = 0 : i64, tpu.core_type = #tpu.core_type<tc>, window_params = [{transform_indices = @transform_0, window_bounds = array<i64: 16, 32>}, {transform_indices = @transform_1, window_bounds = array<i64: 1, 32, 128>}, {transform_indices = @transform_2, window_bounds = array<i64: 1, 1, 128>}, {transform_indices = @transform_3, window_bounds = array<i64: 16, 128>}]} {
    %c0 = arith.constant 0 : index
    %c0_0 = arith.constant 0 : index
    %c0_1 = arith.constant 0 : index
    %0 = vector.load %arg4[%c0, %c0_0, %c0_1] : memref<1x32x128xbf16, #tpu.memory_space<vmem>>, vector<1x32x128xbf16>
    %1 = vector.shape_cast %0 : vector<1x32x128xbf16> to vector<32x128xbf16>
    %c0_2 = arith.constant 0 : index
    %c0_3 = arith.constant 0 : index
    %c0_4 = arith.constant 0 : index
    %2 = vector.load %arg5[%c0_2, %c0_3, %c0_4] : memref<1x1x128xf32, #tpu.memory_space<vmem>>, vector<1x1x128xf32>
    %3 = vector.shape_cast %2 : vector<1x1x128xf32> to vector<1x128xf32>
    %c0_5 = arith.constant 0 : index
    %c0_6 = arith.constant 0 : index
    %4 = vector.load %arg3[%c0_5, %c0_6] : memref<16x32xbf16, #tpu.memory_space<vmem>>, vector<16x32xbf16>
    %cst = arith.constant dense<0.000000e+00> : vector<16x128xf32>
    %5 = tpu.matmul %4, %1, %cst {dimension_numbers = #tpu.dot_dimension_numbers<[1], [0], [0], [1], [0, 0, 1, 1], [], []>} : vector<16x32xbf16>, vector<32x128xbf16>, vector<16x128xf32> -> vector<16x128xf32>
    %6 = vector.broadcast %3 : vector<1x128xf32> to vector<16x128xf32>
    %7 = arith.addf %5, %6 : vector<16x128xf32>
    %cst_7 = arith.constant dense<0xFF800000> : vector<16xf32>
    %8 = vector.multi_reduction <maximumf>, %7, %cst_7 [1] : vector<16x128xf32> to vector<16xf32>
    %9 = vector.shape_cast %8 : vector<16xf32> to vector<16x1xf32>
    %10 = vector.broadcast %9 : vector<16x1xf32> to vector<16x128xf32>
    %11 = arith.subf %7, %10 : vector<16x128xf32>
    %12 = arith.truncf %11 : vector<16x128xf32> to vector<16x128xbf16>
    %13 = math.exp %12 : vector<16x128xbf16>
    %14 = arith.extf %13 : vector<16x128xbf16> to vector<16x128xf32>
    %cst_8 = arith.constant dense<0.000000e+00> : vector<16xf32>
    %15 = vector.multi_reduction <add>, %14, %cst_8 [1] : vector<16x128xf32> to vector<16xf32>
    %16 = vector.shape_cast %15 : vector<16xf32> to vector<16x1xf32>
    %17 = arith.index_cast %arg1 : i32 to index
    %18 = memref.load %arg2[%17] : memref<3xf32, #tpu.memory_space<smem>>
    %19 = tpu.reciprocal %16 {approx = true} : vector<16x1xf32> -> vector<16x1xf32>
    %20 = vector.broadcast %18 : f32 to vector<16x1xf32>
    %21 = arith.mulf %20, %19 : vector<16x1xf32>
    %22 = vector.broadcast %21 : vector<16x1xf32> to vector<16x128xf32>
    %23 = arith.mulf %14, %22 : vector<16x128xf32>
    %c0_i32 = arith.constant 0 : i32
    %24 = arith.cmpi eq, %arg1, %c0_i32 : i32
    %25 = arith.extui %24 : i1 to i32
    %c0_i32_9 = arith.constant 0 : i32
    %26 = arith.cmpi ne, %25, %c0_i32_9 : i32
    scf.if %26 {
      %c0_14 = arith.constant 0 : index
      %c0_15 = arith.constant 0 : index
      %35 = vector.load %arg6[%c0_14, %c0_15] : memref<16x128xf32, #tpu.memory_space<vmem>>, vector<16x128xf32>
      tpu.vector_store %arg6[%c0_14, %c0_15], %23 {strides = array<i32>} : memref<16x128xf32, #tpu.memory_space<vmem>>, vector<16x128xf32>,
    } else {
    }
    %c0_i32_10 = arith.constant 0 : i32
    %27 = arith.cmpi sgt, %arg1, %c0_i32_10 : i32
    %c2_i32 = arith.constant 2 : i32
    %28 = arith.cmpi slt, %arg1, %c2_i32 : i32
    %29 = arith.andi %27, %28 : i1
    %30 = arith.extui %29 : i1 to i32
    %c0_i32_11 = arith.constant 0 : i32
    %31 = arith.cmpi ne, %30, %c0_i32_11 : i32
    scf.if %31 {
      %c0_14 = arith.constant 0 : index
      %c0_15 = arith.constant 0 : index
      %35 = vector.load %arg6[%c0_14, %c0_15] : memref<16x128xf32, #tpu.memory_space<vmem>>, vector<16x128xf32>
      %36 = arith.addf %35, %23 : vector<16x128xf32>
      %c0_16 = arith.constant 0 : index
      %c0_17 = arith.constant 0 : index
      %37 = vector.load %arg6[%c0_16, %c0_17] : memref<16x128xf32, #tpu.memory_space<vmem>>, vector<16x128xf32>
      tpu.vector_store %arg6[%c0_16, %c0_17], %36 {strides = array<i32>} : memref<16x128xf32, #tpu.memory_space<vmem>>, vector<16x128xf32>,
    } else {
    }
    %c2_i32_12 = arith.constant 2 : i32
    %32 = arith.cmpi eq, %arg1, %c2_i32_12 : i32
    %33 = arith.extui %32 : i1 to i32
    %c0_i32_13 = arith.constant 0 : i32
    %34 = arith.cmpi ne, %33, %c0_i32_13 : i32
    scf.if %34 {
      %c0_14 = arith.constant 0 : index
      %c0_15 = arith.constant 0 : index
      %35 = vector.load %arg6[%c0_14, %c0_15] : memref<16x128xf32, #tpu.memory_space<vmem>>, vector<16x128xf32>
      %36 = arith.addf %35, %23 : vector<16x128xf32>
      %37 = math.log %36 : vector<16x128xf32>
      %c0_16 = arith.constant 0 : index
      %c0_17 = arith.constant 0 : index
      %38 = vector.load %arg6[%c0_16, %c0_17] : memref<16x128xf32, #tpu.memory_space<vmem>>, vector<16x128xf32>
      tpu.vector_store %arg6[%c0_16, %c0_17], %37 {strides = array<i32>} : memref<16x128xf32, #tpu.memory_space<vmem>>, vector<16x128xf32>,
    } else {
    }
    return
  }
  func.func @transform_0(%arg0: i32, %arg1: i32, %arg2: memref<3xf32, #tpu.memory_space<smem>>) -> (i32, i32) {
    %c0_i32 = arith.constant 0 : i32
    %c0_i32_0 = arith.constant 0 : i32
    return %arg0, %c0_i32 : i32, i32
  }
  func.func @transform_1(%arg0: i32, %arg1: i32, %arg2: memref<3xf32, #tpu.memory_space<smem>>) -> (i32, i32, i32) {
    %c0_i32 = arith.constant 0 : i32
    %c0_i32_0 = arith.constant 0 : i32
    %c0_i32_1 = arith.constant 0 : i32
    return %arg1, %c0_i32, %c0_i32_0 : i32, i32, i32
  }
  func.func @transform_2(%arg0: i32, %arg1: i32, %arg2: memref<3xf32, #tpu.memory_space<smem>>) -> (i32, i32, i32) {
    %c0_i32 = arith.constant 0 : i32
    %c0_i32_0 = arith.constant 0 : i32
    %c0_i32_1 = arith.constant 0 : i32
    return %arg1, %c0_i32, %c0_i32_0 : i32, i32, i32
  }
  func.func @transform_3(%arg0: i32, %arg1: i32, %arg2: memref<3xf32, #tpu.memory_space<smem>>) -> (i32, i32) {
    %c0_i32 = arith.constant 0 : i32
    %c0_i32_0 = arith.constant 0 : i32
    return %arg0, %c0_i32 : i32, i32
  }
}

</mosaic_0001>

<bundles_post_ra>
// kernel: tpu_custom_call.1
= control target key start
LH: loop header
LB: loop body
LE: loop exit
PB: predicated region body
PF: predicated region fallthrough
CT: control target
= control target key end

     0   :  { %s838_s0 = inlined_call_operand.hbm [shape: f32[3], index: 0, kind: input, shape index: {}]   ;;  %s839_s1 = inlined_call_operand.hbm [shape: bf16[16,32], index: 1, kind: input, shape index: {}]   ;;  %s840_s2 = inlined_call_operand.hbm [shape: bf16[3,32,128], index: 2, kind: input, shape index: {}]   ;;  %s841_s3 = inlined_call_operand.vmem [shape: f32[3,1,128], index: 3, kind: input, shape index: {}]   ;;  %s842_s4 = inlined_call_operand.hbm [shape: f32[16,128], index: 4, kind: output, shape index: {}]  }
   0x1   :  { %s516_s17 = scalar_lea.hbm %s838_s0, 16 }
   0x2   :  { %p517_p0 = scmp.ne.s32.totalorder %s838_s0, %s516_s17  ;;  %p520_p1 = scmp.lt.u32.totalorder %s516_s17, %s838_s0 }
   0x4   :  { %p522_p2 = pnand %p520_p1, %p517_p0 }
   0x6   :  { %525 = shalt.err (!%p522_p2)  }
   0x7   :  { %s646_s22 = smov [#allocation3]  }
   0x8   :  { %10 = dma.hbm_to_smem %s838_s0, 16, %s646_s22, [#allocation2] }
   0x9   :  { %620 = dma.done.wait [#allocation2], 16 }
   0xa   :  { %621 = vsyncadd [#allocation2], 4294967280 }
   0xb   :  { %12 = sfence }
   0xc   :  { %13 = vsyncpa [#allocation5], 0 }
   0xd   :  { %14 = vsyncpa [#allocation8], 0 }
   0xe   :  { %15 = vsyncpa [#allocation6], 0  ;;  %s693_s25 = smov 0   ;;  %s695_s26 = smov 0  }
   0xf   :  { %s697_s27 = smov 0  }
  0x10 LB: > { %s412_s0 = sadd.s32 4294967295, %s644_s27   ;;  %s30_s28 = sadd.s32 1, %s640_s26  ;;  %s644_s27 = sphi %s697_s27, %s21_s27   ;;  %s640_s26 = sphi %s695_s26, %s853_s26   ;;  %s636_s25 = sphi %s693_s25, %s852_s25  }
  0x11   : > { %p31_p3 = scmp.ge.s32.totalorder %s30_s28, 3  ;;  %p413_p4 = scmp.ge.s32.totalorder %s644_s27, 1 }
  0x12   : > { %p132_p5 = scmp.lt.s32.totalorder %s644_s27, 4  ;;  %p720_p7 = scmp.eq.s32.totalorder %s412_s0, 0 }
  0x13   : > { %s855_s28 = smov (%p31_p3, %s30_s28), 0  ;;  %s647_s5 = smov [#allocation4]  }
  0x14   : > { %p714_p6 = pnand %p413_p4, %p132_p5  ;;  %s147_s6 = sshll.u32 %s647_s5, 4  ;;  %s148_s6 = int_to_ptr.vmem [resolvable:$true] %s147_s6 }
  0x15   : > { %s847_s30 = scalar_select %p720_p7, 1, 0 }
  0x16   : > { %s846_s29 = scalar_select %p714_p6, 1, 0 }
  0x17   : > { %p456_p8 = pneg %p714_p6  ;;  %s648_s8 = smov [#allocation7]  }
  0x18   : > { %s160_s9 = sshll.u32 %s648_s8, 4  ;;  %s526_s12 = scalar_lea.hbm %s839_s1, 128  ;;  %s732_s9 = int_to_ptr.vmem [resolvable:$true] %s160_s9 }
  0x19   : > { %p728_p9 = pnand %p720_p7, %p456_p8  ;;  %p527_p10 = scmp.ne.s32.totalorder %s839_s1, %s526_s12 }
  0x1a   : > { %p533_p0 = scmp.lt.u32.totalorder %s526_s12, %s839_s1 }
  0x1b   : > { %p528_p11 = pneg %p728_p9 }
  0x1d   : > { %p529_p12 = pnand %p528_p11, %p527_p10 }
  0x1f   : > { %p530_p13 = pneg %p529_p12 }
  0x21   : > { %p535_p1 = pnand %p533_p0, %p530_p13 }
  0x23   : > { %538 = shalt.err (!%p535_p1)
}
  0x24   : > { %s539_s17 = scalar_lea.vmem %s148_s6, 128  ;;  %p547_p5 = scmp.lt.s32.totalorder %s148_s6, %s148_s6 }
  0x25   : > { %p540_p2 = scmp.ne.s32.totalorder %s148_s6, %s539_s17  ;;  %p548_p8 = scmp.lt.s32.totalorder %s539_s17, %s539_s17 }
  0x27   : > { %p542_p3 = pnand %p540_p2, %p528_p11  ;;  %p549_p7 = por %p548_p8, %p547_p5 }
  0x29   : > { %p543_p4 = pneg %p542_p3 }
  0x2b   : > { %p550_p6 = pnand %p549_p7, %p543_p4 }
  0x2d   : > { %553 = shalt.err (!%p550_p6)
}
  0x2e   : > { %s649_s18 = smov 64   ;;  %s650_s19 = smov 4  }
  0x2f   : > { %459 = dma.hbm_to_vmem [thread:$0]  (!%p728_p9), %s839_s1, 128, %s148_s6, [#allocation5], %s649_s18, %s649_s18, %s650_s19  }
  0x30   : > { %s554_s24 = scalar_lea.hbm %s840_s2, 768 }
  0x31   : > { %p555_p10 = scmp.ne.s32.totalorder %s840_s2, %s554_s24  ;;  %p561_p12 = scmp.lt.u32.totalorder %s554_s24, %s840_s2 }
  0x33   : > { %p557_p6 = pnand %p555_p10, %p528_p11 }
  0x35   : > { %p558_p7 = pneg %p557_p6 }
  0x37   : > { %p563_p13 = pnand %p561_p12, %p558_p7 }
  0x39   : > { %566 = shalt.err (!%p563_p13)
}
  0x3a   : > { %s567_s6 = scalar_lea.vmem %s732_s9, 768  ;;  %p575_p3 = scmp.lt.s32.totalorder %s732_s9, %s732_s9 }
  0x3b   : > { %p568_p0 = scmp.ne.s32.totalorder %s732_s9, %s567_s6  ;;  %p576_p4 = scmp.lt.s32.totalorder %s567_s6, %s567_s6 }
  0x3d   : > { %p570_p1 = pnand %p568_p0, %p528_p11  ;;  %p577_p5 = por %p576_p4, %p575_p3 }
  0x3f   : > { %p571_p2 = pneg %p570_p1 }
  0x41   : > { %p578_p8 = pnand %p577_p5, %p571_p2 }
  0x43   : > { %581 = shalt.err (!%p578_p8)
}
  0x44   : > { %462 = dma.hbm_to_vmem [thread:$0]  (!%p728_p9), %s840_s2, 768, %s732_s9, [#allocation8], %s649_s18, %s649_s18, %s650_s19  }
  0x45   : > { %p849_p10 = scmp.ne.s32.totalorder %s846_s29, 0 }
  0x46   : > { %p850_p6 = scmp.ne.s32.totalorder (!%p849_p10), %s847_s30, 0 }
  0x47   : > { %179 = sbr.rel (%p849_p10) target bundleno = 692 (0x2b4), region = 32 }
  0x4e   : > { %623 = dma.done.wait (%p850_p6), [#allocation5], 128  }
  0x4f   : > { %625 = vsyncadd (%p850_p6), [#allocation5], 4294967168 }
  0x50   : > { %627 = dma.done.wait (%p850_p6), [#allocation8], 768  }
  0x51   : > { %629 = vsyncadd (%p850_p6), [#allocation8], 4294966528  ;;  %v651_v0 = vmov 0.0   ;;  %s432_s7 = sshll.u32 %s636_s25, 4  ;;  %vm652_vm0 = vmmov 0   ;;  %v505_v3 = vld [vmem:[#allocation4] sm:$0xff]   ;;  %s207_s30 = scalar_lea.vmem %s841_s3, %s636_s25 }
  0x52   : > { %436 = vmatprep.subr.bf16.mxu0 %v651_v0  ;;  %440 = vmatprep.mubr.msk.bf16.mxu0 %vm652_vm0, %v651_v0  ;;  %s202_s29 = scalar_lea.vmem [#allocation7], %s432_s7  ;;  %vm234_vm1 = vcmask 261120   ;;  %v421_v4 = vld [vmem:[%s207_s30] ss:$0 sm:$0xff]  ;;  %s295_s15 = sld [smem:[#allocation3 + %s636_s25]] }
  0x53   : > { %v503_v1 = vld [vmem:[%s202_s29] sm:$0xff]   ;;  %v504_v2 = vld [vmem:[%s202_s29 + $0x8] sm:$0xff]   ;;  %p426_p9 = scmp.ne.s32.totalorder %s636_s25, 0 }
  0x54   : > { %437 = vmatpush3.bf16.msra.mxu0 %v503_v1 }
  0x55   : > { %438 = vmatprep.subr.bf16.mxu0 %v651_v0 }
  0x58   : > { %439 = vmatpush3.bf16.msra.mxu0 %v504_v2  ;;  %v298_v22 = vstv %s295_s15 }
  0x5b   : > { %441 = vmatmul.mubr.msk.bf16.vlgmr.msra.gmra.mrb[0].mxu0 %vm234_vm1, %v505_v3 }
 0x12e   : > { %v272_v5 = vpop.f32.mrb[0].mxu0 }
 0x12f   : > { %v273_v6 = vadd.f32 %v421_v4, %v272_v5  ;;  %v442_v7 = vpop.f32.mrb[1].mxu0 }
 0x130   : > { %v275_v8 = vpop.f32.mrb[2].mxu0 }
 0x131   : > { %279 = vmax.xlane.f32.xlu0 %v273_v6  ;;  %v443_v9 = vpop.f32.mrb[3].mxu0  ;;  %v276_v10 = vadd.f32 %v421_v4, %v275_v8 }
 0x135   : > { %281 = vmax.xlane.f32.xlu0 %v276_v10 }
 0x1be   : > { %v280_v11 = vpop.xlane.xlu0 %279 }
 0x1bf   : > { %v283_v13 = vsub.f32 %v273_v6, %v280_v11 }
 0x1c2   : > { %v282_v12 = vpop.xlane.xlu0 %281 }
 0x1c3   : > { %v284_v14 = vsub.f32 %v276_v10, %v282_v12 }
 0x1c5   : > { %v285_v15 = vpack.c.bf16 %v284_v14, %v283_v13 }
 0x1c7   : > { %v287_v16 = vmul.bf16 1069105081, %v285_v15 }
 0x1c9   : > { %506 = vpow.bf16 %v287_v16 }
 0x1d4   : > { %v507_v17 = vpop.eup %506 }
 0x1d5   : > { %v289_v18 = vunpack.c.l.bf16 %v507_v17  ;;  %v290_v19 = vunpack.c.h.bf16 %v507_v17 }
 0x1d7   : > { %291 = vadd.xlane.f32.xlu1 %v289_v18 }
 0x1db   : > { %293 = vadd.xlane.f32.xlu1 %v290_v19 }
 0x264   : > { %v292_v20 = vpop.xlane.xlu1 %291 }
 0x265   : > { %508 = vrcp.f32 %v292_v20 }
 0x268   : > { %v294_v21 = vpop.xlane.xlu1 %293 }
 0x269   : > { %510 = vrcp.f32 %v294_v21 }
 0x26f   : > { %v509_v23 = vpop.eup %508 }
 0x270   : > { %v299_v24 = vmul.f32 %v509_v23, %v298_v22  ;;  %306 = sbr.rel (%p426_p9) target bundleno = 633 (0x279), region = 44 }
 0x272   : > { %v301_v25 = vmul.f32 %v299_v24, %v289_v18 }
 0x273   : > { %v511_v26 = vpop.eup %510 }
 0x274   : > { %v300_v27 = vmul.f32 %v511_v26, %v298_v22  ;;  %307 = vst [vmem:[#allocation9] sm:$0xff] (!%p426_p9), %v301_v25 }
 0x276   : > { %v302_v28 = vmul.f32 %v300_v27, %v290_v19 }
 0x278   : > { %308 = vst [vmem:[#allocation9 + $0x8] sm:$0xff] %v302_v28 }
 0x279 PF: > { %p309_p11 = scmp.gt.s32.totalorder %s636_s25, 0  ;;  %p310_p7 = scmp.lt.s32.totalorder %s636_s25, 2 }
 0x27b   : > { %p311_p12 = pnand %p310_p7, %p309_p11 }
 0x27d   : > { %314 = sbr.rel (%p311_p12) target bundleno = 644 (0x284), region = 48  ;;  %v315_v29 = vld [vmem:[#allocation9] sm:$0xff] (!%p311_p12) }
 0x27e   : > { %v317_v31 = vadd.f32 (!%p311_p12), %v315_v29, %v301_v25 }
 0x27f   : > { %v316_v30 = vld [vmem:[#allocation9 + $0x8] sm:$0xff] (!%p311_p12) }
 0x280   : > { %v318_v32 = vadd.f32 (!%p311_p12), %v316_v30, %v302_v28  ;;  %319 = vst [vmem:[#allocation9] sm:$0xff] (!%p311_p12), %v317_v31 }
 0x282   : > { %320 = vst [vmem:[#allocation9 + $0x8] sm:$0xff] (!%p311_p12), %v318_v32 }
 0x284 PF: > { %p427_p13 = scmp.ne.s32.totalorder %s636_s25, 2 }
 0x286   : > { %324 = sbr.rel (%p427_p13) target bundleno = 666 (0x29a), region = 52 }
 0x287   : > { %v325_v33 = vld [vmem:[#allocation9] sm:$0xff] (!%p427_p13) }
 0x288   : > { %v327_v35 = vadd.f32 (!%p427_p13), %v325_v33, %v301_v25 }
 0x289   : > { %v326_v34 = vld [vmem:[#allocation9 + $0x8] sm:$0xff] (!%p427_p13) }
 0x28a   : > { %v328_v36 = vadd.f32 (!%p427_p13), %v326_v34, %v302_v28  ;;  %512 = vlog2.f32 (!%p427_p13), %v327_v35 }
 0x28c   : > { %514 = vlog2.f32 (!%p427_p13), %v328_v36 }
 0x294   : > { %v513_v37 = vpop.eup %512 }
 0x295   : > { %v330_v39 = vmul.f32 0.6931472, %v513_v37 }
 0x296   : > { %v515_v38 = vpop.eup %514 }
 0x297   : > { %v332_v40 = vmul.f32 0.6931472, %v515_v38  ;;  %333 = vst [vmem:[#allocation9] sm:$0xff] %v330_v39 }
 0x299   : > { %334 = vst [vmem:[#allocation9 + $0x8] sm:$0xff] %v332_v40 }
 0x29a PF: > { %p803_p0 = scmp.eq.s32.totalorder %s412_s0, 2  ;;  %s653_s25 = smov [#allocation9]  }
 0x29b   : > { %s344_s17 = sshll.u32 %s653_s25, 4  ;;  %s345_s17 = int_to_ptr.vmem [resolvable:$true] %s344_s17 }
 0x29c   : > { %s582_s18 = scalar_lea.vmem %s345_s17, 256  ;;  %p589_p4 = scmp.lt.s32.totalorder %s345_s17, %s345_s17 }
 0x29d   : > { %p583_p1 = scmp.ne.s32.totalorder %s345_s17, %s582_s18  ;;  %p590_p5 = scmp.lt.s32.totalorder %s582_s18, %s582_s18 }
 0x29f   : > { %p584_p2 = pnand %p583_p1, %p803_p0  ;;  %p591_p8 = por %p590_p5, %p589_p4 }
 0x2a1   : > { %p585_p3 = pneg %p584_p2 }
 0x2a3   : > { %p592_p10 = pnand %p591_p8, %p585_p3 }
 0x2a5   : > { %595 = shalt.err (!%p592_p10)
}
 0x2a6   : > { %s596_s0 = scalar_lea.hbm %s842_s4, 256 }
 0x2a7   : > { %p597_p6 = scmp.ne.s32.totalorder %s842_s4, %s596_s0  ;;  %p602_p7 = scmp.lt.u32.totalorder %s596_s0, %s842_s4 }
 0x2a9   : > { %p598_p9 = pnand %p597_p6, %p803_p0 }
 0x2ab   : > { %p599_p11 = pneg %p598_p9 }
 0x2ad   : > { %p604_p12 = pnand %p602_p7, %p599_p11 }
 0x2af   : > { %607 = shalt.err (!%p604_p12)
}
 0x2b0   : > { %s654_s5 = smov 128   ;;  %s655_s8 = smov 8  }
 0x2b1   : > { %453 = dma.vmem_to_hbm [thread:$0]  (%p803_p0), %s345_s17, 256, %s842_s4, [#allocation6], %s654_s5, %s654_s5, %s655_s8  }
 0x2b2   : > { %631 = dma.done.wait (%p803_p0), [#allocation6], 256  }
 0x2b3   : > { %633 = vsyncadd (%p803_p0), [#allocation6], 4294967040 }
 0x2b4 PF: > { %s21_s27 = sadd.s32 1, %s644_s27   ;;  %s852_s25 = smov %s640_s26 }
 0x2b5   : > { %p18_p13 = scmp.ge.s32.totalorder %s21_s27, 5   ;;  %s853_s26 = smov %s855_s28 }
 0x2b7   :  { %20 = sbr.rel (!%p18_p13) target bundleno = 16 (0x10), region = 81 }
 0x2be   :  { %360 = vsyncpa [#allocation5], 1 }
 0x2bf   :  { %362 = vsyncpa [#allocation5 + $0x1], 1 }
 0x2c0   :  { %363 = vsyncpa [#allocation8], 1 }
 0x2c1   :  { %364 = vsyncpa [#allocation6], 1 }
 0x2c2   :  { %366 = vsyncpa [#allocation6 + $0x1], 1 }

// kernel: tpu_custom_call.1
= control target key start
LH: loop header
LB: loop body
LE: loop exit
PB: predicated region body
PF: predicated region fallthrough
CT: control target
= control target key end

     0   :  { %s838_s0 = inlined_call_operand.hbm [shape: f32[3], index: 0, kind: input, shape index: {}]   ;;  %s839_s1 = inlined_call_operand.hbm [shape: bf16[16,32], index: 1, kind: input, shape index: {}]   ;;  %s840_s2 = inlined_call_operand.hbm [shape: bf16[3,32,128], index: 2, kind: input, shape index: {}]   ;;  %s841_s3 = inlined_call_operand.vmem [shape: f32[3,1,128], index: 3, kind: input, shape index: {}]   ;;  %s842_s4 = inlined_call_operand.hbm [shape: f32[16,128], index: 4, kind: output, shape index: {}]  }
   0x1   :  { %s516_s17 = scalar_lea.hbm %s838_s0, 16 }
   0x2   :  { %p517_p0 = scmp.ne.s32.totalorder %s838_s0, %s516_s17  ;;  %p520_p1 = scmp.lt.u32.totalorder %s516_s17, %s838_s0 }
   0x4   :  { %p522_p2 = pnand %p520_p1, %p517_p0 }
   0x6   :  { %525 = shalt.err (!%p522_p2)  }
   0x7   :  { %s646_s22 = smov [#allocation3]  }
   0x8   :  { %10 = dma.hbm_to_smem %s838_s0, 16, %s646_s22, [#allocation2] }
   0x9   :  { %620 = dma.done.wait [#allocation2], 16 }
   0xa   :  { %621 = vsyncadd [#allocation2], 4294967280 }
   0xb   :  { %12 = sfence }
   0xc   :  { %13 = vsyncpa [#allocation5], 0 }
   0xd   :  { %14 = vsyncpa [#allocation8], 0 }
   0xe   :  { %15 = vsyncpa [#allocation6], 0  ;;  %s693_s25 = smov 0   ;;  %s695_s26 = smov 0  }
   0xf   :  { %s697_s27 = smov 0  }
  0x10 LB: > { %s412_s0 = sadd.s32 4294967295, %s644_s27   ;;  %s30_s28 = sadd.s32 1, %s640_s26  ;;  %s644_s27 = sphi %s697_s27, %s21_s27   ;;  %s640_s26 = sphi %s695_s26, %s853_s26   ;;  %s636_s25 = sphi %s693_s25, %s852_s25  }
  0x11   : > { %p31_p3 = scmp.ge.s32.totalorder %s30_s28, 3  ;;  %p413_p4 = scmp.ge.s32.totalorder %s644_s27, 1 }
  0x12   : > { %p132_p5 = scmp.lt.s32.totalorder %s644_s27, 4  ;;  %p720_p7 = scmp.eq.s32.totalorder %s412_s0, 0 }
  0x13   : > { %s855_s28 = smov (%p31_p3, %s30_s28), 0  ;;  %s647_s5 = smov [#allocation4]  }
  0x14   : > { %p714_p6 = pnand %p413_p4, %p132_p5  ;;  %s147_s6 = sshll.u32 %s647_s5, 4  ;;  %s148_s6 = int_to_ptr.vmem [resolvable:$true] %s147_s6 }
  0x15   : > { %s847_s30 = scalar_select %p720_p7, 1, 0 }
  0x16   : > { %s846_s29 = scalar_select %p714_p6, 1, 0 }
  0x17   : > { %p456_p8 = pneg %p714_p6  ;;  %s648_s8 = smov [#allocation7]  }
  0x18   : > { %s160_s9 = sshll.u32 %s648_s8, 4  ;;  %s526_s12 = scalar_lea.hbm %s839_s1, 128  ;;  %s732_s9 = int_to_ptr.vmem [resolvable:$true] %s160_s9 }
  0x19   : > { %p728_p9 = pnand %p720_p7, %p456_p8  ;;  %p527_p10 = scmp.ne.s32.totalorder %s839_s1, %s526_s12 }
  0x1a   : > { %p533_p0 = scmp.lt.u32.totalorder %s526_s12, %s839_s1 }
  0x1b   : > { %p528_p11 = pneg %p728_p9 }
  0x1d   : > { %p529_p12 = pnand %p528_p11, %p527_p10 }
  0x1f   : > { %p530_p13 = pneg %p529_p12 }
  0x21   : > { %p535_p1 = pnand %p533_p0, %p530_p13 }
  0x23   : > { %538 = shalt.err (!%p535_p1)
}
  0x24   : > { %s539_s17 = scalar_lea.vmem %s148_s6, 128  ;;  %p547_p5 = scmp.lt.s32.totalorder %s148_s6, %s148_s6 }
  0x25   : > { %p540_p2 = scmp.ne.s32.totalorder %s148_s6, %s539_s17  ;;  %p548_p8 = scmp.lt.s32.totalorder %s539_s17, %s539_s17 }
  0x27   : > { %p542_p3 = pnand %p540_p2, %p528_p11  ;;  %p549_p7 = por %p548_p8, %p547_p5 }
  0x29   : > { %p543_p4 = pneg %p542_p3 }
  0x2b   : > { %p550_p6 = pnand %p549_p7, %p543_p4 }
  0x2d   : > { %553 = shalt.err (!%p550_p6)
}
  0x2e   : > { %s649_s18 = smov 64   ;;  %s650_s19 = smov 4  }
  0x2f   : > { %459 = dma.hbm_to_vmem [thread:$0]  (!%p728_p9), %s839_s1, 128, %s148_s6, [#allocation5], %s649_s18, %s649_s18, %s650_s19  }
  0x30   : > { %s554_s24 = scalar_lea.hbm %s840_s2, 768 }
  0x31   : > { %p555_p10 = scmp.ne.s32.totalorder %s840_s2, %s554_s24  ;;  %p561_p12 = scmp.lt.u32.totalorder %s554_s24, %s840_s2 }
  0x33   : > { %p557_p6 = pnand %p555_p10, %p528_p11 }
  0x35   : > { %p558_p7 = pneg %p557_p6 }
  0x37   : > { %p563_p13 = pnand %p561_p12, %p558_p7 }
  0x39   : > { %566 = shalt.err (!%p563_p13)
}
  0x3a   : > { %s567_s6 = scalar_lea.vmem %s732_s9, 768  ;;  %p575_p3 = scmp.lt.s32.totalorder %s732_s9, %s732_s9 }
  0x3b   : > { %p568_p0 = scmp.ne.s32.totalorder %s732_s9, %s567_s6  ;;  %p576_p4 = scmp.lt.s32.totalorder %s567_s6, %s567_s6 }
  0x3d   : > { %p570_p1 = pnand %p568_p0, %p528_p11  ;;  %p577_p5 = por %p576_p4, %p575_p3 }
  0x3f   : > { %p571_p2 = pneg %p570_p1 }
  0x41   : > { %p578_p8 = pnand %p577_p5, %p571_p2 }
  0x43   : > { %581 = shalt.err (!%p578_p8)
}
  0x44   : > { %462 = dma.hbm_to_vmem [thread:$0]  (!%p728_p9), %s840_s2, 768, %s732_s9, [#allocation8], %s649_s18, %s649_s18, %s650_s19  }
  0x45   : > { %p849_p10 = scmp.ne.s32.totalorder %s846_s29, 0 }
  0x46   : > { %p850_p6 = scmp.ne.s32.totalorder (!%p849_p10), %s847_s30, 0 }
  0x47   : > { %179 = sbr.rel (%p849_p10) target bundleno = 692 (0x2b4), region = 32 }
  0x4e   : > { %623 = dma.done.wait (%p850_p6), [#allocation5], 128  }
  0x4f   : > { %625 = vsyncadd (%p850_p6), [#allocation5], 4294967168 }
  0x50   : > { %627 = dma.done.wait (%p850_p6), [#allocation8], 768  }
  0x51   : > { %629 = vsyncadd (%p850_p6), [#allocation8], 4294966528  ;;  %v651_v0 = vmov 0.0   ;;  %s432_s7 = sshll.u32 %s636_s25, 4  ;;  %vm652_vm0 = vmmov 0   ;;  %v505_v3 = vld [vmem:[#allocation4] sm:$0xff]   ;;  %s207_s30 = scalar_lea.vmem %s841_s3, %s636_s25 }
  0x52   : > { %436 = vmatprep.subr.bf16.mxu0 %v651_v0  ;;  %440 = vmatprep.mubr.msk.bf16.mxu0 %vm652_vm0, %v651_v0  ;;  %s202_s29 = scalar_lea.vmem [#allocation7], %s432_s7  ;;  %vm234_vm1 = vcmask 261120   ;;  %v421_v4 = vld [vmem:[%s207_s30] ss:$0 sm:$0xff]  ;;  %s295_s15 = sld [smem:[#allocation3 + %s636_s25]] }
  0x53   : > { %v503_v1 = vld [vmem:[%s202_s29] sm:$0xff]   ;;  %v504_v2 = vld [vmem:[%s202_s29 + $0x8] sm:$0xff]   ;;  %p426_p9 = scmp.ne.s32.totalorder %s636_s25, 0 }
  0x54   : > { %437 = vmatpush3.bf16.msra.mxu0 %v503_v1 }
  0x55   : > { %438 = vmatprep.subr.bf16.mxu0 %v651_v0 }
  0x58   : > { %439 = vmatpush3.bf16.msra.mxu0 %v504_v2  ;;  %v298_v22 = vstv %s295_s15 }
  0x5b   : > { %441 = vmatmul.mubr.msk.bf16.vlgmr.msra.gmra.mrb[0].mxu0 %vm234_vm1, %v505_v3 }
 0x12e   : > { %v272_v5 = vpop.f32.mrb[0].mxu0 }
 0x12f   : > { %v273_v6 = vadd.f32 %v421_v4, %v272_v5  ;;  %v442_v7 = vpop.f32.mrb[1].mxu0 }
 0x130   : > { %v275_v8 = vpop.f32.mrb[2].mxu0 }
 0x131   : > { %279 = vmax.xlane.f32.xlu0 %v273_v6  ;;  %v443_v9 = vpop.f32.mrb[3].mxu0  ;;  %v276_v10 = vadd.f32 %v421_v4, %v275_v8 }
 0x135   : > { %281 = vmax.xlane.f32.xlu0 %v276_v10 }
 0x1be   : > { %v280_v11 = vpop.xlane.xlu0 %279 }
 0x1bf   : > { %v283_v13 = vsub.f32 %v273_v6, %v280_v11 }
 0x1c2   : > { %v282_v12 = vpop.xlane.xlu0 %281 }
 0x1c3   : > { %v284_v14 = vsub.f32 %v276_v10, %v282_v12 }
 0x1c5   : > { %v285_v15 = vpack.c.bf16 %v284_v14, %v283_v13 }
 0x1c7   : > { %v287_v16 = vmul.bf16 1069105081, %v285_v15 }
 0x1c9   : > { %506 = vpow.bf16 %v287_v16 }
 0x1d4   : > { %v507_v17 = vpop.eup %506 }
 0x1d5   : > { %v289_v18 = vunpack.c.l.bf16 %v507_v17  ;;  %v290_v19 = vunpack.c.h.bf16 %v507_v17 }
 0x1d7   : > { %291 = vadd.xlane.f32.xlu1 %v289_v18 }
 0x1db   : > { %293 = vadd.xlane.f32.xlu1 %v290_v19 }
 0x264   : > { %v292_v20 = vpop.xlane.xlu1 %291 }
 0x265   : > { %508 = vrcp.f32 %v292_v20 }
 0x268   : > { %v294_v21 = vpop.xlane.xlu1 %293 }
 0x269   : > { %510 = vrcp.f32 %v294_v21 }
 0x26f   : > { %v509_v23 = vpop.eup %508 }
 0x270   : > { %v299_v24 = vmul.f32 %v509_v23, %v298_v22  ;;  %306 = sbr.rel (%p426_p9) target bundleno = 633 (0x279), region = 44 }
 0x272   : > { %v301_v25 = vmul.f32 %v299_v24, %v289_v18 }
 0x273   : > { %v511_v26 = vpop.eup %510 }
 0x274   : > { %v300_v27 = vmul.f32 %v511_v26, %v298_v22  ;;  %307 = vst [vmem:[#allocation9] sm:$0xff] (!%p426_p9), %v301_v25 }
 0x276   : > { %v302_v28 = vmul.f32 %v300_v27, %v290_v19 }
 0x278   : > { %308 = vst [vmem:[#allocation9 + $0x8] sm:$0xff] %v302_v28 }
 0x279 PF: > { %p309_p11 = scmp.gt.s32.totalorder %s636_s25, 0  ;;  %p310_p7 = scmp.lt.s32.totalorder %s636_s25, 2 }
 0x27b   : > { %p311_p12 = pnand %p310_p7, %p309_p11 }
 0x27d   : > { %314 = sbr.rel (%p311_p12) target bundleno = 644 (0x284), region = 48  ;;  %v315_v29 = vld [vmem:[#allocation9] sm:$0xff] (!%p311_p12) }
 0x27e   : > { %v317_v31 = vadd.f32 (!%p311_p12), %v315_v29, %v301_v25 }
 0x27f   : > { %v316_v30 = vld [vmem:[#allocation9 + $0x8] sm:$0xff] (!%p311_p12) }
 0x280   : > { %v318_v32 = vadd.f32 (!%p311_p12), %v316_v30, %v302_v28  ;;  %319 = vst [vmem:[#allocation9] sm:$0xff] (!%p311_p12), %v317_v31 }
 0x282   : > { %320 = vst [vmem:[#allocation9 + $0x8] sm:$0xff] (!%p311_p12), %v318_v32 }
 0x284 PF: > { %p427_p13 = scmp.ne.s32.totalorder %s636_s25, 2 }
 0x286   : > { %324 = sbr.rel (%p427_p13) target bundleno = 666 (0x29a), region = 52 }
 0x287   : > { %v325_v33 = vld [vmem:[#allocation9] sm:$0xff] (!%p427_p13) }
 0x288   : > { %v327_v35 = vadd.f32 (!%p427_p13), %v325_v33, %v301_v25 }
 0x289   : > { %v326_v34 = vld [vmem:[#allocation9 + $0x8] sm:$0xff] (!%p427_p13) }
 0x28a   : > { %v328_v36 = vadd.f32 (!%p427_p13), %v326_v34, %v302_v28  ;;  %512 = vlog2.f32 (!%p427_p13), %v327_v35 }
 0x28c   : > { %514 = vlog2.f32 (!%p427_p13), %v328_v36 }
 0x294   : > { %v513_v37 = vpop.eup %512 }
 0x295   : > { %v330_v39 = vmul.f32 0.6931472, %v513_v37 }
 0x296   : > { %v515_v38 = vpop.eup %514 }
 0x297   : > { %v332_v40 = vmul.f32 0.6931472, %v515_v38  ;;  %333 = vst [vmem:[#allocation9] sm:$0xff] %v330_v39 }
 0x299   : > { %334 = vst [vmem:[#allocation9 + $0x8] sm:$0xff] %v332_v40 }
 0x29a PF: > { %p803_p0 = scmp.eq.s32.totalorder %s412_s0, 2  ;;  %s653_s25 = smov [#allocation9]  }
 0x29b   : > { %s344_s17 = sshll.u32 %s653_s25, 4  ;;  %s345_s17 = int_to_ptr.vmem [resolvable:$true] %s344_s17 }
 0x29c   : > { %s582_s18 = scalar_lea.vmem %s345_s17, 256  ;;  %p589_p4 = scmp.lt.s32.totalorder %s345_s17, %s345_s17 }
 0x29d   : > { %p583_p1 = scmp.ne.s32.totalorder %s345_s17, %s582_s18  ;;  %p590_p5 = scmp.lt.s32.totalorder %s582_s18, %s582_s18 }
 0x29f   : > { %p584_p2 = pnand %p583_p1, %p803_p0  ;;  %p591_p8 = por %p590_p5, %p589_p4 }
 0x2a1   : > { %p585_p3 = pneg %p584_p2 }
 0x2a3   : > { %p592_p10 = pnand %p591_p8, %p585_p3 }
 0x2a5   : > { %595 = shalt.err (!%p592_p10)
}
 0x2a6   : > { %s596_s0 = scalar_lea.hbm %s842_s4, 256 }
 0x2a7   : > { %p597_p6 = scmp.ne.s32.totalorder %s842_s4, %s596_s0  ;;  %p602_p7 = scmp.lt.u32.totalorder %s596_s0, %s842_s4 }
 0x2a9   : > { %p598_p9 = pnand %p597_p6, %p803_p0 }
 0x2ab   : > { %p599_p11 = pneg %p598_p9 }
 0x2ad   : > { %p604_p12 = pnand %p602_p7, %p599_p11 }
 0x2af   : > { %607 = shalt.err (!%p604_p12)
}
 0x2b0   : > { %s654_s5 = smov 128   ;;  %s655_s8 = smov 8  }
 0x2b1   : > { %453 = dma.vmem_to_hbm [thread:$0]  (%p803_p0), %s345_s17, 256, %s842_s4, [#allocation6], %s654_s5, %s654_s5, %s655_s8  }
 0x2b2   : > { %631 = dma.done.wait (%p803_p0), [#allocation6], 256  }
 0x2b3   : > { %633 = vsyncadd (%p803_p0), [#allocation6], 4294967040 }
 0x2b4 PF: > { %s21_s27 = sadd.s32 1, %s644_s27   ;;  %s852_s25 = smov %s640_s26 }
 0x2b5   : > { %p18_p13 = scmp.ge.s32.totalorder %s21_s27, 5   ;;  %s853_s26 = smov %s855_s28 }
 0x2b7   :  { %20 = sbr.rel (!%p18_p13) target bundleno = 16 (0x10), region = 81 }
 0x2be   :  { %360 = vsyncpa [#allocation5], 1 }
 0x2bf   :  { %362 = vsyncpa [#allocation5 + $0x1], 1 }
 0x2c0   :  { %363 = vsyncpa [#allocation8], 1 }
 0x2c1   :  { %364 = vsyncpa [#allocation6], 1 }
 0x2c2   :  { %366 = vsyncpa [#allocation6 + $0x1], 1 }

// kernel: tpu_custom_call.1
= control target key start
LH: loop header
LB: loop body
LE: loop exit
PB: predicated region body
PF: predicated region fallthrough
CT: control target
= control target key end

     0   :  { %s997_s0 = inlined_call_operand.hbm [shape: f32[3], index: 0, kind: input, shape index: {}]   ;;  %s998_s1 = inlined_call_operand.hbm [shape: bf16[16,32], index: 1, kind: input, shape index: {}]   ;;  %s999_s2 = inlined_call_operand.hbm [shape: bf16[3,32,128], index: 2, kind: input, shape index: {}]   ;;  %s1000_s3 = inlined_call_operand.vmem [shape: f32[3,1,128], index: 3, kind: input, shape index: {}]   ;;  %s1001_s4 = inlined_call_operand.hbm [shape: f32[16,128], index: 4, kind: output, shape index: {}]  }
   0x1   :  { %s592_s17 = scalar_lea.hbm %s997_s0, 16 }
   0x2   :  { %p593_p0 = scmp.ne.s32.totalorder %s997_s0, %s592_s17  ;;  %p596_p1 = scmp.lt.u32.totalorder %s592_s17, %s997_s0 }
   0x4   :  { %p598_p2 = pnand %p596_p1, %p593_p0 }
   0x6   :  { %601 = shalt.err (!%p598_p2)  }
   0x7   :  { %s748_s22 = smov [#allocation3]  }
   0x8   :  { %10 = dma.hbm_to_smem %s997_s0, 16, %s748_s22, [#allocation2] }
   0x9   :  { %710 = dma.done.wait [#allocation2], 16 }
   0xa   :  { %711 = vsyncadd [#allocation2], 4294967280 }
   0xb   :  { %12 = sfence }
   0xc   :  { %13 = vsyncpa [#allocation5], 0 }
   0xd   :  { %14 = vsyncpa [#allocation8], 0 }
   0xe   :  { %16 = vsyncpa [#allocation8 + $0x1], 0 }
   0xf   :  { %17 = vsyncpa [#allocation6], 0  ;;  %s795_s25 = smov 0   ;;  %s797_s26 = smov 0  }
  0x10   :  { %s799_s27 = smov 0   ;;  %s801_s28 = smov 0  }
  0x11   :  { %s803_s29 = smov 0   ;;  %s805_s30 = smov 0  }
  0x12 LB: > { %s466_s0 = sadd.s32 4294967295, %s746_s30   ;;  %p81_p3 = scmp.ne.s32.totalorder %s730_s26, %s726_s25  ;;  %s746_s30 = sphi %s805_s30, %s23_s30   ;;  %s742_s29 = sphi %s803_s29, %s1019_s29   ;;  %s738_s28 = sphi %s801_s28, %s1018_s28   ;;  %s734_s27 = sphi %s799_s27, %s1017_s27   ;;  %s730_s26 = sphi %s797_s26, %s1016_s26   ;;  %s726_s25 = sphi %s795_s25, %s1015_s25  }
  0x13   : > { %p827_p4 = scmp.eq.s32.totalorder %s466_s0, 0  ;;  %p467_p5 = scmp.ge.s32.totalorder %s746_s30, 1 }
  0x14   : > { %p144_p6 = scmp.lt.s32.totalorder %s746_s30, 4  ;;  %s749_s8 = smov [#allocation4]  }
  0x15   : > { %s1006_s5 = scalar_select %p827_p4, 1, 0 }
  0x16   : > { %p835_p7 = por %p827_p4, %p81_p3  ;;  %p839_p8 = pnand %p467_p5, %p144_p6 }
  0x17   : > { %s159_s9 = sshll.u32 %s749_s8, 4  ;;  %s32_s11 = sadd.s32 1, %s742_s29  ;;  %s160_s9 = int_to_ptr.vmem [resolvable:$true] %s159_s9 }
  0x18   : > { %s1007_s6 = scalar_select %p835_p7, 1, 0 }
  0x19   : > { %s1008_s7 = scalar_select %p839_p8, 1, 0 }
  0x1a   : > { %p509_p9 = pneg %p839_p8  ;;  %s602_s14 = scalar_lea.hbm %s998_s1, 128 }
  0x1b   : > { %p603_p11 = scmp.ne.s32.totalorder %s998_s1, %s602_s14  ;;  %p609_p1 = scmp.lt.u32.totalorder %s602_s14, %s998_s1 }
  0x1c   : > { %p847_p10 = pnand %p509_p9, %p827_p4 }
  0x1e   : > { %p604_p12 = pneg %p847_p10 }
  0x20   : > { %p605_p13 = pnand %p604_p12, %p603_p11 }
  0x22   : > { %p606_p0 = pneg %p605_p13 }
  0x24   : > { %p611_p2 = pnand %p609_p1, %p606_p0 }
  0x26   : > { %614 = shalt.err (!%p611_p2)
}
  0x27   : > { %s615_s19 = scalar_lea.vmem %s160_s9, 128  ;;  %p623_p9 = scmp.lt.s32.totalorder %s160_s9, %s160_s9 }
  0x28   : > { %p616_p3 = scmp.ne.s32.totalorder %s160_s9, %s615_s19  ;;  %p624_p7 = scmp.lt.s32.totalorder %s615_s19, %s615_s19 }
  0x2a   : > { %p618_p5 = pnand %p616_p3, %p604_p12  ;;  %p625_p4 = por %p624_p7, %p623_p9 }
  0x2c   : > { %p619_p6 = pneg %p618_p5 }
  0x2e   : > { %p626_p8 = pnand %p625_p4, %p619_p6 }
  0x30   : > { %629 = shalt.err (!%p626_p8)
}
  0x31   : > { %s750_s20 = smov 64   ;;  %s751_s21 = smov 4  }
  0x32   : > { %512 = dma.hbm_to_vmem [thread:$0]  (!%p847_p10), %s998_s1, 128, %s160_s9, [#allocation5], %s750_s20, %s750_s20, %s751_s21  }
  0x33   : > { %p33_p4 = scmp.ge.s32.totalorder %s32_s11, 3  ;;  %s68_s24 = sadd.s32 1, %s734_s27 }
  0x34   : > { %p75_p7 = scmp.ne.s32.totalorder %s734_s27, %s730_s26  ;;  %p76_p8 = scmp.eq.s32.totalorder %s746_s30, 0 }
  0x35   : > { %s1021_s11 = smov (%p33_p4, %s32_s11), 0  ;;  %p518_p12 = scmp.lt.s32.totalorder %s746_s30, 3 }
  0x36   : > { %p77_p11 = por %p76_p8, %p75_p7  ;;  %s65_s25 = ssub.s32 %s742_s29, %s1021_s11 }
  0x37   : > { %s173_s8 = sand.u32 1, %s734_s27   ;;  %p66_p13 = scmp.eq.s32.totalorder %s65_s25, 0 }
  0x38   : > { %s470_s10 = sshll.u32 %s173_s8, 4  ;;  %s487_s12 = sshll.u32 %s742_s29, 8 }
  0x39   : > { %s883_s13 = scalar_select %p66_p13, %s734_s27, %s68_s24  }
  0x3a   : > { %s888_s9 = scalar_lea.hbm %s999_s2, %s487_s12  ;;  %s177_s16 = scalar_lea.vmem [#allocation7], %s470_s10 }
  0x3b   : > { %s184_s17 = sshll.u32 %s177_s16, 4  ;;  %p890_p10 = pnand %p518_p12, %p77_p11  ;;  %s894_s17 = int_to_ptr.vmem [resolvable:$true] %s184_s17 }
  0x3c   : > { %s896_s19 = scalar_lea.sflag [#allocation8], %s173_s8  ;;  %s630_s22 = scalar_lea.hbm %s888_s9, 256 }
  0x3d   : > { %p631_p0 = scmp.ne.s32.totalorder %s888_s9, %s630_s22  ;;  %p632_p1 = pneg %p890_p10 }
  0x3e   : > { %s635_s25 = scalar_lea.hbm %s999_s2, 768  ;;  %p636_p5 = scmp.lt.u32.totalorder %s888_s9, %s999_s2 }
  0x3f   : > { %p633_p2 = pnand %p632_p1, %p631_p0  ;;  %p637_p6 = scmp.lt.u32.totalorder %s635_s25, %s630_s22 }
  0x40   : > { %p639_p4 = scmp.lt.u32.totalorder %s630_s22, %s888_s9 }
  0x41   : > { %p634_p3 = pneg %p633_p2  ;;  %p638_p9 = por %p637_p6, %p636_p5 }
  0x43   : > { %p640_p7 = por %p639_p4, %p638_p9 }
  0x45   : > { %p641_p8 = pnand %p640_p7, %p634_p3 }
  0x47   : > { %644 = shalt.err (!%p641_p8)
}
  0x48   : > { %s645_s8 = scalar_lea.vmem %s894_s17, 256  ;;  %s752_s14 = smov [#allocation7]  }
  0x49   : > { %p646_p11 = scmp.ne.s32.totalorder %s894_s17, %s645_s8  ;;  %s650_s15 = sshll.u32 %s752_s14, 4  ;;  %s651_s15 = int_to_ptr.vmem [resolvable:$false] %s650_s15 }
  0x4a   : > { %s652_s16 = scalar_lea.vmem %s651_s15, 512  ;;  %p653_p0 = scmp.lt.s32.totalorder %s894_s17, %s651_s15 }
  0x4b   : > { %p648_p12 = pnand %p646_p11, %p632_p1  ;;  %p654_p2 = scmp.lt.s32.totalorder %s652_s16, %s645_s8 }
  0x4d   : > { %p649_p13 = pneg %p648_p12  ;;  %p655_p5 = por %p654_p2, %p653_p0 }
  0x4f   : > { %p656_p6 = pnand %p655_p5, %p649_p13 }
  0x51   : > { %659 = shalt.err (!%p656_p6)
}
  0x52   : > { %516 = dma.hbm_to_vmem [thread:$0]  (!%p890_p10), %s888_s9, 256, %s894_s17, %s896_s19, %s750_s20, %s750_s20, %s751_s21  }
  0x53   : > { %p1011_p1 = scmp.ne.s32.totalorder %s1008_s7, 0 }
  0x54   : > { %p1012_p3 = scmp.ne.s32.totalorder (!%p1011_p1), %s1006_s5, 0 }
  0x55   : > { %202 = sbr.rel (%p1011_p1) target bundleno = 707 (0x2c3), region = 32 }
  0x5c   : > { %713 = dma.done.wait (%p1012_p3), [#allocation5], 128  }
  0x5d   : > { %715 = vsyncadd (%p1012_p3), [#allocation5], 4294967168  ;;  %s208_s22 = sand.u32 1, %s730_s26   ;;  %p1013_p9 = scmp.ne.s32.totalorder %s1007_s6, 0 }
  0x5e   : > { %s475_s18 = sshll.u32 %s208_s22, 4  ;;  %s209_s23 = scalar_lea.sflag [#allocation8], %s208_s22 }
  0x5f   : > { %s212_s24 = scalar_lea.vmem [#allocation7], %s475_s18 }
  0x60   : > { %717 = dma.done.wait (%p1013_p9), %s209_s23, 256  }
  0x61   : > { %719 = vsyncadd (%p1013_p9), %s209_s23, 4294967040  ;;  %v753_v0 = vmov 0.0   ;;  %vm754_vm0 = vmmov 0   ;;  %v579_v1 = vld [vmem:[%s212_s24] sm:$0xff]   ;;  %v580_v2 = vld [vmem:[%s212_s24 + $0x8] sm:$0xff]   ;;  %vm269_vm1 = vcmask 261120  }
  0x62   : > { %491 = vmatprep.subr.bf16.mxu0 %v753_v0  ;;  %495 = vmatprep.mubr.msk.bf16.mxu0 %vm754_vm0, %v753_v0  ;;  %v581_v3 = vld [vmem:[#allocation4] sm:$0xff]   ;;  %p234_p10 = scmp.lt.s32.totalorder %s738_s28, 2  ;;  %s330_s21 = sld [smem:[#allocation3 + %s738_s28]] }
  0x63   : > { %492 = vmatpush3.bf16.msra.mxu0 %v579_v1  ;;  %p481_p4 = scmp.ne.s32.totalorder %s738_s28, 0 }
  0x64   : > { %493 = vmatprep.subr.bf16.mxu0 %v753_v0  ;;  %s235_s5 = scalar_select %p234_p10, %s738_s28, 2 }
  0x66   : > { %s236_s20 = scalar_lea.vmem %s1000_s3, %s235_s5 }
  0x67   : > { %494 = vmatpush3.bf16.msra.mxu0 %v580_v2  ;;  %v476_v4 = vld [vmem:[%s236_s20] ss:$0 sm:$0xff] }
  0x68   : > { %v333_v22 = vstv %s330_s21 }
  0x6a   : > { %496 = vmatmul.mubr.msk.bf16.vlgmr.msra.gmra.mrb[0].mxu0 %vm269_vm1, %v581_v3 }
 0x13d   : > { %v307_v5 = vpop.f32.mrb[0].mxu0 }
 0x13e   : > { %v308_v6 = vadd.f32 %v476_v4, %v307_v5  ;;  %v497_v7 = vpop.f32.mrb[1].mxu0 }
 0x13f   : > { %v310_v8 = vpop.f32.mrb[2].mxu0 }
 0x140   : > { %314 = vmax.xlane.f32.xlu0 %v308_v6  ;;  %v498_v9 = vpop.f32.mrb[3].mxu0  ;;  %v311_v10 = vadd.f32 %v476_v4, %v310_v8 }
 0x144   : > { %316 = vmax.xlane.f32.xlu0 %v311_v10 }
 0x1cd   : > { %v315_v11 = vpop.xlane.xlu0 %314 }
 0x1ce   : > { %v318_v13 = vsub.f32 %v308_v6, %v315_v11 }
 0x1d1   : > { %v317_v12 = vpop.xlane.xlu0 %316 }
 0x1d2   : > { %v319_v14 = vsub.f32 %v311_v10, %v317_v12 }
 0x1d4   : > { %v320_v15 = vpack.c.bf16 %v319_v14, %v318_v13 }
 0x1d6   : > { %v322_v16 = vmul.bf16 1069105081, %v320_v15 }
 0x1d8   : > { %582 = vpow.bf16 %v322_v16 }
 0x1e3   : > { %v583_v17 = vpop.eup %582 }
 0x1e4   : > { %v324_v18 = vunpack.c.l.bf16 %v583_v17  ;;  %v325_v19 = vunpack.c.h.bf16 %v583_v17 }
 0x1e6   : > { %326 = vadd.xlane.f32.xlu1 %v324_v18 }
 0x1ea   : > { %328 = vadd.xlane.f32.xlu1 %v325_v19 }
 0x273   : > { %v327_v20 = vpop.xlane.xlu1 %326 }
 0x274   : > { %584 = vrcp.f32 %v327_v20 }
 0x277   : > { %v329_v21 = vpop.xlane.xlu1 %328 }
 0x278   : > { %586 = vrcp.f32 %v329_v21 }
 0x27e   : > { %v585_v23 = vpop.eup %584 }
 0x27f   : > { %v334_v24 = vmul.f32 %v585_v23, %v333_v22  ;;  %341 = sbr.rel (%p481_p4) target bundleno = 648 (0x288), region = 44 }
 0x281   : > { %v336_v25 = vmul.f32 %v334_v24, %v324_v18 }
 0x282   : > { %v587_v26 = vpop.eup %586 }
 0x283   : > { %v335_v27 = vmul.f32 %v587_v26, %v333_v22  ;;  %342 = vst [vmem:[#allocation9] sm:$0xff] (!%p481_p4), %v336_v25 }
 0x285   : > { %v337_v28 = vmul.f32 %v335_v27, %v325_v19 }
 0x287   : > { %343 = vst [vmem:[#allocation9 + $0x8] sm:$0xff] %v337_v28 }
 0x288 PF: > { %p344_p7 = scmp.gt.s32.totalorder %s738_s28, 0 }
 0x28a   : > { %p346_p8 = pnand %p344_p7, %p234_p10 }
 0x28c   : > { %349 = sbr.rel (%p346_p8) target bundleno = 659 (0x293), region = 48  ;;  %v350_v29 = vld [vmem:[#allocation9] sm:$0xff] (!%p346_p8) }
 0x28d   : > { %v352_v31 = vadd.f32 (!%p346_p8), %v350_v29, %v336_v25 }
 0x28e   : > { %v351_v30 = vld [vmem:[#allocation9 + $0x8] sm:$0xff] (!%p346_p8) }
 0x28f   : > { %v353_v32 = vadd.f32 (!%p346_p8), %v351_v30, %v337_v28  ;;  %354 = vst [vmem:[#allocation9] sm:$0xff] (!%p346_p8), %v352_v31 }
 0x291   : > { %355 = vst [vmem:[#allocation9 + $0x8] sm:$0xff] (!%p346_p8), %v353_v32 }
 0x293 PF: > { %p482_p11 = scmp.ne.s32.totalorder %s738_s28, 2 }
 0x295   : > { %359 = sbr.rel (%p482_p11) target bundleno = 681 (0x2a9), region = 52 }
 0x296   : > { %v360_v33 = vld [vmem:[#allocation9] sm:$0xff] (!%p482_p11) }
 0x297   : > { %v362_v35 = vadd.f32 (!%p482_p11), %v360_v33, %v336_v25 }
 0x298   : > { %v361_v34 = vld [vmem:[#allocation9 + $0x8] sm:$0xff] (!%p482_p11) }
 0x299   : > { %v363_v36 = vadd.f32 (!%p482_p11), %v361_v34, %v337_v28  ;;  %588 = vlog2.f32 (!%p482_p11), %v362_v35 }
 0x29b   : > { %590 = vlog2.f32 (!%p482_p11), %v363_v36 }
 0x2a3   : > { %v589_v37 = vpop.eup %588 }
 0x2a4   : > { %v365_v39 = vmul.f32 0.6931472, %v589_v37 }
 0x2a5   : > { %v591_v38 = vpop.eup %590 }
 0x2a6   : > { %v367_v40 = vmul.f32 0.6931472, %v591_v38  ;;  %368 = vst [vmem:[#allocation9] sm:$0xff] %v365_v39 }
 0x2a8   : > { %369 = vst [vmem:[#allocation9 + $0x8] sm:$0xff] %v367_v40 }
 0x2a9 PF: > { %p953_p12 = scmp.eq.s32.totalorder %s466_s0, 2  ;;  %s755_s28 = smov [#allocation9]  }
 0x2aa   : > { %s379_s17 = sshll.u32 %s755_s28, 4  ;;  %s380_s17 = int_to_ptr.vmem [resolvable:$true] %s379_s17 }
 0x2ab   : > { %s660_s19 = scalar_lea.vmem %s380_s17, 256  ;;  %p667_p5 = scmp.lt.s32.totalorder %s380_s17, %s380_s17 }
 0x2ac   : > { %p661_p13 = scmp.ne.s32.totalorder %s380_s17, %s660_s19  ;;  %p668_p6 = scmp.lt.s32.totalorder %s660_s19, %s660_s19 }
 0x2ae   : > { %p662_p0 = pnand %p661_p13, %p953_p12  ;;  %p669_p1 = por %p668_p6, %p667_p5 }
 0x2b0   : > { %p663_p2 = pneg %p662_p0 }
 0x2b2   : > { %p670_p3 = pnand %p669_p1, %p663_p2 }
 0x2b4   : > { %673 = shalt.err (!%p670_p3)
}
 0x2b5   : > { %s674_s0 = scalar_lea.hbm %s1001_s4, 256 }
 0x2b6   : > { %p675_p9 = scmp.ne.s32.totalorder %s1001_s4, %s674_s0  ;;  %p680_p7 = scmp.lt.u32.totalorder %s674_s0, %s1001_s4 }
 0x2b8   : > { %p676_p10 = pnand %p675_p9, %p953_p12 }
 0x2ba   : > { %p677_p4 = pneg %p676_p10 }
 0x2bc   : > { %p682_p8 = pnand %p680_p7, %p677_p4 }
 0x2be   : > { %685 = shalt.err (!%p682_p8)
}
 0x2bf   : > { %s756_s16 = smov 128   ;;  %s757_s22 = smov 8  }
 0x2c0   : > { %506 = dma.vmem_to_hbm [thread:$0]  (%p953_p12), %s380_s17, 256, %s1001_s4, [#allocation6], %s756_s16, %s756_s16, %s757_s22  }
 0x2c1   : > { %721 = dma.done.wait (%p953_p12), [#allocation6], 256  }
 0x2c2   : > { %723 = vsyncadd (%p953_p12), [#allocation6], 4294967040 }
 0x2c3 PF: > { %s23_s30 = sadd.s32 1, %s746_s30   ;;  %s1015_s25 = smov %s730_s26 }
 0x2c4   : > { %p20_p11 = scmp.ge.s32.totalorder %s23_s30, 5   ;;  %s1016_s26 = smov %s734_s27 }
 0x2c5   : > { %s1017_s27 = smov %s883_s13  ;;  %s1018_s28 = smov %s742_s29 }
 0x2c6   : > { %s1019_s29 = smov %s1021_s11  ;;  %22 = sbr.rel (!%p20_p11) target bundleno = 18 (0x12), region = 91 }
 0x2cd   :  { %395 = vsyncpa [#allocation5], 1 }
 0x2ce   :  { %397 = vsyncpa [#allocation5 + $0x1], 1 }
 0x2cf   :  { %398 = vsyncpa [#allocation8], 1 }
 0x2d0   :  { %400 = vsyncpa [#allocation8 + $0x1], 1 }
 0x2d1   :  { %401 = vsyncpa [#allocation6], 1 }
 0x2d2   :  { %403 = vsyncpa [#allocation6 + $0x1], 1 }

</bundles_post_ra>
